<compile_context>
chip_gen: v7x
topology: tpu7x:2x2x1
jax: 0.10.0
libtpu: 0.0.40
codegen_flags: <defaults>
</compile_context>

<pallas_src>
import functools

import jax
import jax.numpy as jnp
from jax.experimental import pallas as pl
from jax.experimental.pallas import tpu as pltpu

EPS = 1e-5


def _round_up(x, m):
    return (x + m - 1) // m * m


def _vmem_limit(block_bytes):
    # double-buffered in + out blocks + params/intermediates + headroom,
    # capped at 64 MiB (v7x physical VMEM per TensorCore).
    need = 6 * block_bytes + (4 << 20)
    return int(min(max(need, 32 << 20), 64 << 20))


def _channel_mix(x_f32, wp_ref, use_bf16, small_c):
    """Channel-mixing product (C_out, C_in) @ (C_in, T) -> (C_out, T), f32."""
    C = wp_ref.shape[0]
    if small_c:
        # C < 8: a CxC matmul wastes the MXU; do an unrolled VPU broadcast-MAC.
        acc = wp_ref[:, 0:1] * x_f32[0:1, :]
        for i in range(1, C):
            acc = acc + wp_ref[:, i:i + 1] * x_f32[i:i + 1, :]
        return acc
    if use_bf16:
        return jnp.dot(wp_ref[...].astype(jnp.bfloat16),
                       x_f32.astype(jnp.bfloat16),
                       preferred_element_type=jnp.float32)
    return jnp.dot(wp_ref[...], x_f32, preferred_element_type=jnp.float32)


# --------------------------- fused single-pass kernel -----------------------

def _fused_kernel(x_ref, wp_ref, bp_ref, rs_ref, o_ref, *,
                  inv_n, use_bf16, small_c):
    x = x_ref[0].astype(jnp.float32)                       # (C, HWp)
    # Single-traversal stats.  Zero padding does not bias the sums; inv_n uses
    # the true (unpadded) element count.
    s = jnp.sum(x)
    q = jnp.sum(x * x)
    mean = s * inv_n
    var = q * inv_n - mean * mean
    inv_std = jax.lax.rsqrt(var + EPS)
    y = _channel_mix(x, wp_ref, use_bf16, small_c)         # (C, HWp), f32
    o_ref[0] = (inv_std * (y - mean * rs_ref[...]) + bp_ref[...]).astype(o_ref.dtype)


# --------------------------- two-pass tiled kernels --------------------------

def _stats_kernel(x_ref, o_ref):
    # Accumulate per-sample sum / sum-of-squares over HW tiles (t axis is the
    # reduction axis -> output block index constant over t).
    t = pl.program_id(1)
    x = x_ref[0].astype(jnp.float32)                       # (C, THW)
    s = jnp.sum(x)
    q = jnp.sum(x * x)
    row = jax.lax.broadcasted_iota(jnp.int32, (2, 128), 0)
    upd = jnp.where(row == 0, s, q)                        # row0: sum, row1: sumsq

    @pl.when(t == 0)
    def _():
        o_ref[...] = jnp.zeros_like(o_ref)

    o_ref[0] = o_ref[0] + upd


def _norm_kernel(stats_ref, x_ref, wp_ref, bp_ref, rs_ref, o_ref, *,
                 inv_n, use_bf16, small_c):
    st = stats_ref[0]                                      # (2, 128)
    s = st[0:1, 0:1]                                       # (1, 1)
    q = st[1:2, 0:1]                                       # (1, 1)
    mean = s * inv_n
    var = q * inv_n - mean * mean
    inv_std = jax.lax.rsqrt(var + EPS)
    x = x_ref[0].astype(jnp.float32)                       # (C, THW)
    y = _channel_mix(x, wp_ref, use_bf16, small_c)
    o_ref[0] = (inv_std * (y - mean * rs_ref[...]) + bp_ref[...]).astype(o_ref.dtype)


# ----------------------------------- wrapper ---------------------------------

def prenorm_forward(x_nchw, gamma, beta, conv_w, conv_b, *,
                    hw_tile=None, out_dtype=None):
    """x_nchw: (N, C, H, W).  Returns (N, C, H, W).

    hw_tile: if set, force the two-pass HW-tiled path with that tile size.
    out_dtype: output dtype (e.g. jnp.bfloat16 if the consumer accepts it).
    """
    N, C, H, W = x_nchw.shape
    HW = H * W
    out_dtype = x_nchw.dtype if out_dtype is None else out_dtype

    # ---- fold GroupNorm affine + conv bias into the 1x1-conv weight ----
    gamma = gamma.astype(jnp.float32)
    beta = beta.astype(jnp.float32)
    w2 = conv_w.reshape(C, C).astype(jnp.float32)          # (C_out, C_in)
    wp = w2 * gamma[None, :]                               # W'  (C_out, C_in)
    bp = (w2 @ beta + conv_b.astype(jnp.float32)).reshape(C, 1)   # b'
    rs = jnp.sum(wp, axis=1).reshape(C, 1)                 # W' @ ones(C)

    inv_n = 1.0 / float(C * HW)                            # true element count
    small_c = C < 8
    use_bf16 = (not small_c) and C >= 128

    x = x_nchw.reshape(N, C, HW)
    sample_bytes = C * _round_up(HW, 128) * x.dtype.itemsize

    if hw_tile is None and sample_bytes <= (2 << 20):
        # ------------------ fused path: one full sample per grid step --------
        HWp = _round_up(HW, 128)                           # lane-dense stores
        if HWp != HW:
            x = jnp.pad(x, ((0, 0), (0, 0), (0, HWp - HW)))
        kernel = functools.partial(_fused_kernel, inv_n=inv_n,
                                   use_bf16=use_bf16, small_c=small_c)
        out = pl.pallas_call(
            kernel,
            out_shape=jax.ShapeDtypeStruct((N, C, HWp), out_dtype),
            grid_spec=pltpu.PrefetchScalarGridSpec(
                num_scalar_prefetch=0,
                grid=(N,),
                in_specs=[
                    pl.BlockSpec((1, C, HWp), lambda b: (b, 0, 0)),  # x sample
                    pl.BlockSpec((C, C), lambda b: (0, 0)),          # W'
                    pl.BlockSpec((C, 1), lambda b: (0, 0)),          # b'
                    pl.BlockSpec((C, 1), lambda b: (0, 0)),          # rowsum(W')
                ],
                out_specs=pl.BlockSpec((1, C, HWp), lambda b: (b, 0, 0)),
            ),
            compiler_params=pltpu.CompilerParams(
                dimension_semantics=("parallel",),
                vmem_limit_bytes=_vmem_limit(C * HWp * 4),
            ),
        )(x, wp, bp, rs)
        return out[:, :, :HW].reshape(N, C, H, W)

    # ---------------------- two-pass HW-tiled path ---------------------------
    THW = 512 if hw_tile is None else max(128, _round_up(int(hw_tile), 128))
    HWp = _round_up(HW, THW)
    n_t = HWp // THW
    if HWp != HW:
        x = jnp.pad(x, ((0, 0), (0, 0), (0, HWp - HW)))

    # Pass 1: per-sample sum / sum-of-squares, accumulated over the HW axis.
    stats = pl.pallas_call(
        _stats_kernel,
        out_shape=jax.ShapeDtypeStruct((N, 2, 128), jnp.float32),
        grid_spec=pltpu.PrefetchScalarGridSpec(
            num_scalar_prefetch=0,
            grid=(N, n_t),
            in_specs=[pl.BlockSpec((1, C, THW), lambda b, t: (b, 0, t))],
            out_specs=pl.BlockSpec((1, 2, 128), lambda b, t: (b, 0, 0)),
        ),
        compiler_params=pltpu.CompilerParams(
            dimension_semantics=("parallel", "arbitrary"),
            vmem_limit_bytes=_vmem_limit(C * THW * x.dtype.itemsize),
        ),
    )(x)

    # Pass 2: y = inv_std * (W' @ x - mean * rowsum) + b', tile by tile.
    kernel = functools.partial(_norm_kernel, inv_n=inv_n,
                               use_bf16=use_bf16, small_c=small_c)
    out = pl.pallas_call(
        kernel,
        out_shape=jax.ShapeDtypeStruct((N, C, HWp), out_dtype),
        grid_spec=pltpu.PrefetchScalarGridSpec(
            num_scalar_prefetch=0,
            grid=(N, n_t),
            in_specs=[
                pl.BlockSpec((1, 2, 128), lambda b, t: (b, 0, 0)),   # stats
                pl.BlockSpec((1, C, THW), lambda b, t: (b, 0, t)),   # x tile
                pl.BlockSpec((C, C), lambda b, t: (0, 0)),           # W'
                pl.BlockSpec((C, 1), lambda b, t: (0, 0)),           # b'
                pl.BlockSpec((C, 1), lambda b, t: (0, 0)),           # rowsum(W')
            ],
            out_specs=pl.BlockSpec((1, C, THW), lambda b, t: (b, 0, t)),
        ),
        compiler_params=pltpu.CompilerParams(
            dimension_semantics=("parallel", "parallel"),
            vmem_limit_bytes=_vmem_limit(C * THW * 4),
        ),
    )(stats, x, wp, bp, rs)

    return out[:, :, :HW].reshape(N, C, H, W)


# --------------------------------- reference ---------------------------------

def _reference(x_nchw, gamma, beta, conv_w, conv_b):
    N, C, H, W = x_nchw.shape
    xf = x_nchw.reshape(N, -1)
    mean = xf.mean(axis=1).reshape(N, 1, 1, 1)
    var = ((xf - xf.mean(axis=1, keepdims=True)) ** 2).mean(axis=1).reshape(N, 1, 1, 1)
    xn = (x_nchw - mean) / jnp.sqrt(var + EPS)
    xn = xn * gamma.reshape(1, C, 1, 1) + beta.reshape(1, C, 1, 1)
    y = jnp.einsum('oc,nchw->nohw', conv_w, xn) + conv_b.reshape(1, C, 1, 1)
    return y


def _make_params(key, C):
    k2, k3, k4, k5 = jax.random.split(key, 4)
    gamma = 1.0 + 0.1 * jax.random.normal(k2, (C,), dtype=jnp.float32)
    beta = 0.1 * jax.random.normal(k3, (C,), dtype=jnp.float32)
    conv_w = 0.2 * jax.random.normal(k4, (C, C), dtype=jnp.float32)
    conv_b = 0.1 * jax.random.normal(k5, (C,), dtype=jnp.float32)
    return gamma, beta, conv_w, conv_b


if __name__ == "__main__":
    key = jax.random.PRNGKey(0)
    kx, kp, kx2, kx3, kp3 = jax.random.split(key, 5)

    # --- main small case: batch=2, dim=4, spatial=16 (fused, VPU small-C path) ---
    N, C, H, W = 2, 4, 16, 16
    x = jax.random.normal(kx, (N, C, H, W), dtype=jnp.float32)
    gamma, beta, conv_w, conv_b = _make_params(kp, C)
    y_ref = _reference(x, gamma, beta, conv_w, conv_b)

    y = prenorm_forward(x, gamma, beta, conv_w, conv_b)
    jax.block_until_ready(y)
    assert jnp.allclose(y, y_ref, atol=2e-4, rtol=2e-4), "fused path mismatch"

    # --- same inputs through the two-pass HW-tiled path (forced tile=128) ---
    y_t = prenorm_forward(x, gamma, beta, conv_w, conv_b, hw_tile=128)
    jax.block_until_ready(y_t)
    assert jnp.allclose(y_t, y_ref, atol=2e-4, rtol=2e-4), "tiled path mismatch"

    # --- non-128-multiple spatial dim (exercises lane padding) ---
    x2 = jax.random.normal(kx2, (2, 4, 10, 10), dtype=jnp.float32)
    y2_ref = _reference(x2, gamma, beta, conv_w, conv_b)
    y2 = prenorm_forward(x2, gamma, beta, conv_w, conv_b)
    y2t = prenorm_forward(x2, gamma, beta, conv_w, conv_b, hw_tile=128)
    jax.block_until_ready((y2, y2t))
    assert jnp.allclose(y2, y2_ref, atol=2e-4, rtol=2e-4), "padded fused mismatch"
    assert jnp.allclose(y2t, y2_ref, atol=2e-4, rtol=2e-4), "padded tiled mismatch"

    # --- larger channel count: exercises the bf16 MXU path (loose tolerance) ---
    C3 = 128
    x3 = jax.random.normal(kx3, (1, C3, 8, 8), dtype=jnp.float32)
    g3, b3, w3, cb3 = _make_params(kp3, C3)
    y3_ref = _reference(x3, g3, b3, w3, cb3)
    y3 = prenorm_forward(x3, g3, b3, w3, cb3)
    jax.block_until_ready(y3)
    assert jnp.allclose(y3, y3_ref, atol=1e-1, rtol=5e-2), "bf16 MXU path mismatch"

    print("KERNEL_OK")
</pallas_src>

<mosaic_0001>
module attributes {stable_mosaic.version = 11 : i64} {
  func.func @_fused_kernel(%arg0: i32, %arg1: memref<1x4x256xf32, #tpu.memory_space<vmem>>, %arg2: memref<4x4xf32, #tpu.memory_space<vmem>>, %arg3: memref<4x1xf32, #tpu.memory_space<vmem>>, %arg4: memref<4x1xf32, #tpu.memory_space<vmem>>, %arg5: memref<1x4x256xf32, #tpu.memory_space<vmem>>) attributes {dimension_semantics = [#tpu.dimension_semantics<parallel>], iteration_bounds = array<i64: 2>, scalar_prefetch = 0 : i64, scratch_operands = 0 : i64, tpu.core_type = #tpu.core_type<tc>, window_params = [{transform_indices = @transform_0, window_bounds = array<i64: 1, 4, 256>}, {pipeline_mode = #tpu.pipeline_mode<synchronous>, transform_indices = @transform_1, window_bounds = array<i64: 4, 4>}, {pipeline_mode = #tpu.pipeline_mode<synchronous>, transform_indices = @transform_2, window_bounds = array<i64: 4, 1>}, {pipeline_mode = #tpu.pipeline_mode<synchronous>, transform_indices = @transform_3, window_bounds = array<i64: 4, 1>}, {transform_indices = @transform_4, window_bounds = array<i64: 1, 4, 256>}]} {
    %c0 = arith.constant 0 : index
    %c0_0 = arith.constant 0 : index
    %c0_1 = arith.constant 0 : index
    %0 = vector.load %arg1[%c0, %c0_0, %c0_1] : memref<1x4x256xf32, #tpu.memory_space<vmem>>, vector<1x4x256xf32>
    %1 = vector.shape_cast %0 : vector<1x4x256xf32> to vector<4x256xf32>
    %2 = vector.shape_cast %1 : vector<4x256xf32> to vector<1x4x256xf32>
    %cst = arith.constant dense<0.000000e+00> : vector<1xf32>
    %3 = vector.multi_reduction <add>, %2, %cst [1, 2] : vector<1x4x256xf32> to vector<1xf32>
    %4 = vector.shape_cast %3 : vector<1xf32> to vector<1x1x1xf32>
    %5 = vector.extract %4[0, 0, 0] : f32 from vector<1x1x1xf32>
    %6 = arith.mulf %1, %1 : vector<4x256xf32>
    %7 = vector.shape_cast %6 : vector<4x256xf32> to vector<1x4x256xf32>
    %cst_2 = arith.constant dense<0.000000e+00> : vector<1xf32>
    %8 = vector.multi_reduction <add>, %7, %cst_2 [1, 2] : vector<1x4x256xf32> to vector<1xf32>
    %9 = vector.shape_cast %8 : vector<1xf32> to vector<1x1x1xf32>
    %10 = vector.extract %9[0, 0, 0] : f32 from vector<1x1x1xf32>
    %cst_3 = arith.constant 9.765625E-4 : f32
    %11 = arith.mulf %5, %cst_3 : f32
    %cst_4 = arith.constant 9.765625E-4 : f32
    %12 = arith.mulf %10, %cst_4 : f32
    %13 = arith.mulf %11, %11 : f32
    %14 = arith.subf %12, %13 : f32
    %cst_5 = arith.constant 9.99999974E-6 : f32
    %15 = arith.addf %14, %cst_5 : f32
    %16 = math.rsqrt %15 : f32
    %c0_6 = arith.constant 0 : index
    %c0_7 = arith.constant 0 : index
    %17 = vector.load %arg2[%c0_6, %c0_7] : memref<4x4xf32, #tpu.memory_space<vmem>>, vector<4x1xf32>
    %18 = vector.extract_strided_slice %1 {offsets = [0, 0], sizes = [1, 256], strides = [1, 1]} : vector<4x256xf32> to vector<1x256xf32>
    %19 = vector.broadcast %17 : vector<4x1xf32> to vector<4x256xf32>
    %20 = vector.broadcast %18 : vector<1x256xf32> to vector<4x256xf32>
    %21 = arith.mulf %19, %20 : vector<4x256xf32>
    %c0_8 = arith.constant 0 : index
    %c1 = arith.constant 1 : index
    %22 = vector.load %arg2[%c0_8, %c1] : memref<4x4xf32, #tpu.memory_space<vmem>>, vector<4x1xf32>
    %23 = vector.extract_strided_slice %1 {offsets = [1, 0], sizes = [1, 256], strides = [1, 1]} : vector<4x256xf32> to vector<1x256xf32>
    %24 = vector.broadcast %22 : vector<4x1xf32> to vector<4x256xf32>
    %25 = vector.broadcast %23 : vector<1x256xf32> to vector<4x256xf32>
    %26 = arith.mulf %24, %25 : vector<4x256xf32>
    %27 = arith.addf %21, %26 : vector<4x256xf32>
    %c0_9 = arith.constant 0 : index
    %c2 = arith.constant 2 : index
    %28 = vector.load %arg2[%c0_9, %c2] : memref<4x4xf32, #tpu.memory_space<vmem>>, vector<4x1xf32>
    %29 = vector.extract_strided_slice %1 {offsets = [2, 0], sizes = [1, 256], strides = [1, 1]} : vector<4x256xf32> to vector<1x256xf32>
    %30 = vector.broadcast %28 : vector<4x1xf32> to vector<4x256xf32>
    %31 = vector.broadcast %29 : vector<1x256xf32> to vector<4x256xf32>
    %32 = arith.mulf %30, %31 : vector<4x256xf32>
    %33 = arith.addf %27, %32 : vector<4x256xf32>
    %c0_10 = arith.constant 0 : index
    %c3 = arith.constant 3 : index
    %34 = vector.load %arg2[%c0_10, %c3] : memref<4x4xf32, #tpu.memory_space<vmem>>, vector<4x1xf32>
    %35 = vector.extract_strided_slice %1 {offsets = [3, 0], sizes = [1, 256], strides = [1, 1]} : vector<4x256xf32> to vector<1x256xf32>
    %36 = vector.broadcast %34 : vector<4x1xf32> to vector<4x256xf32>
    %37 = vector.broadcast %35 : vector<1x256xf32> to vector<4x256xf32>
    %38 = arith.mulf %36, %37 : vector<4x256xf32>
    %39 = arith.addf %33, %38 : vector<4x256xf32>
    %c0_11 = arith.constant 0 : index
    %c0_12 = arith.constant 0 : index
    %40 = vector.load %arg4[%c0_11, %c0_12] : memref<4x1xf32, #tpu.memory_space<vmem>>, vector<4x1xf32>
    %41 = vector.broadcast %11 : f32 to vector<4x1xf32>
    %42 = arith.mulf %41, %40 : vector<4x1xf32>
    %43 = vector.broadcast %42 : vector<4x1xf32> to vector<4x256xf32>
    %44 = arith.subf %39, %43 : vector<4x256xf32>
    %45 = vector.broadcast %16 : f32 to vector<4x256xf32>
    %46 = arith.mulf %45, %44 : vector<4x256xf32>
    %c0_13 = arith.constant 0 : index
    %c0_14 = arith.constant 0 : index
    %47 = vector.load %arg3[%c0_13, %c0_14] : memref<4x1xf32, #tpu.memory_space<vmem>>, vector<4x1xf32>
    %48 = vector.broadcast %47 : vector<4x1xf32> to vector<4x256xf32>
    %49 = arith.addf %46, %48 : vector<4x256xf32>
    %c0_15 = arith.constant 0 : index
    %c0_16 = arith.constant 0 : index
    %c0_17 = arith.constant 0 : index
    %50 = vector.load %arg5[%c0_15, %c0_16, %c0_17] : memref<1x4x256xf32, #tpu.memory_space<vmem>>, vector<1x4x256xf32>
    %51 = vector.shape_cast %50 : vector<1x4x256xf32> to vector<4x256xf32>
    %52 = vector.shape_cast %49 : vector<4x256xf32> to vector<1x4x256xf32>
    tpu.vector_store %arg5[%c0_15, %c0_16, %c0_17], %52 {strides = array<i32>} : memref<1x4x256xf32, #tpu.memory_space<vmem>>, vector<1x4x256xf32>,
    return
  }
  func.func @transform_0(%arg0: i32) -> (i32, i32, i32) {
    %c0_i32 = arith.constant 0 : i32
    %c0_i32_0 = arith.constant 0 : i32
    %c0_i32_1 = arith.constant 0 : i32
    return %arg0, %c0_i32, %c0_i32_0 : i32, i32, i32
  }
  func.func @transform_1(%arg0: i32) -> (i32, i32) {
    %c0_i32 = arith.constant 0 : i32
    %c0_i32_0 = arith.constant 0 : i32
    %c0_i32_1 = arith.constant 0 : i32
    return %c0_i32, %c0_i32_0 : i32, i32
  }
  func.func @transform_2(%arg0: i32) -> (i32, i32) {
    %c0_i32 = arith.constant 0 : i32
    %c0_i32_0 = arith.constant 0 : i32
    %c0_i32_1 = arith.constant 0 : i32
    return %c0_i32, %c0_i32_0 : i32, i32
  }
  func.func @transform_3(%arg0: i32) -> (i32, i32) {
    %c0_i32 = arith.constant 0 : i32
    %c0_i32_0 = arith.constant 0 : i32
    %c0_i32_1 = arith.constant 0 : i32
    return %c0_i32, %c0_i32_0 : i32, i32
  }
  func.func @transform_4(%arg0: i32) -> (i32, i32, i32) {
    %c0_i32 = arith.constant 0 : i32
    %c0_i32_0 = arith.constant 0 : i32
    %c0_i32_1 = arith.constant 0 : i32
    return %arg0, %c0_i32, %c0_i32_0 : i32, i32, i32
  }
}

</mosaic_0001>

<bundles_post_ra>
// kernel: tpu_custom_call.1
= control target key start
LH: loop header
LB: loop body
LE: loop exit
PB: predicated region body
PF: predicated region fallthrough
CT: control target
= control target key end

     0   :  { %9 = vsyncpa [#allocation3], 0  ;;  %s869_s0 = inlined_call_operand.hbm [shape: f32[2,4,256], index: 0, kind: input, shape index: {}]   ;;  %s870_s1 = inlined_call_operand.vmem [shape: f32[4,4], index: 1, kind: input, shape index: {}]   ;;  %s871_s2 = inlined_call_operand.vmem [shape: f32[4,1], index: 2, kind: input, shape index: {}]   ;;  %s872_s3 = inlined_call_operand.vmem [shape: f32[4,1], index: 3, kind: input, shape index: {}]   ;;  %s873_s4 = inlined_call_operand.hbm [shape: f32[2,4,256], index: 4, kind: output, shape index: {}]  }
   0x1   :  { %11 = vsyncpa [#allocation3 + $0x1], 0 }
   0x2   :  { %12 = vsyncpa [#allocation4], 0 }
   0x3   :  { %14 = vsyncpa [#allocation4 + $0x1], 0  ;;  %s680_s15 = smov 0   ;;  %s682_s16 = smov 0  }
   0x4   :  { %s684_s17 = smov 0   ;;  %s686_s18 = smov 0  }
   0x5 LB: > { %s701_s19 = sadd.s32 4294967295, %s647_s18   ;;  %s470_s20 = sadd.s32 4294967294, %s647_s18   ;;  %s647_s18 = sphi %s686_s18, %s888_s18   ;;  %s643_s17 = sphi %s684_s17, %s887_s17   ;;  %s639_s16 = sphi %s682_s16, %s886_s16   ;;  %s635_s15 = sphi %s680_s15, %s885_s15  }
   0x6   : > { %s705_s21 = sadd.s32 1, %s647_s18   ;;  %s27_s22 = sadd.s32 1, %s643_s17 }
   0x7   : > { %s24_s23 = ssub.s32 %s647_s18, %s705_s21  ;;  %p34_p0 = scmp.ne.s32.totalorder %s643_s17, %s639_s16 }
   0x8   : > { %p25_p1 = scmp.eq.s32.totalorder %s24_s23, 0  ;;  %p35_p2 = scmp.eq.s32.totalorder %s647_s18, 0 }
   0x9   : > { %p40_p3 = scmp.ne.s32.totalorder %s639_s16, %s635_s15  ;;  %p41_p4 = scmp.eq.s32.totalorder %s701_s19, 0 }
   0xa   : > { %s717_s24 = scalar_select %p25_p1, %s643_s17, %s27_s22  }
   0xb   : > { %p719_p5 = por %p35_p2, %p34_p0  ;;  %p723_p6 = por %p41_p4, %p40_p3 }
   0xc   : > { %p127_p7 = scmp.eq.s32.totalorder %s701_s19, 1  ;;  %p133_p8 = scmp.eq.s32.totalorder %s470_s20, 1 }
   0xd   : > { %p504_p10 = scmp.lt.s32.totalorder %s647_s18, 2  ;;  %s162_s29 = sand.u32 1, %s643_s17  }
   0xe   : > { %p730_p11 = por %p127_p7, %p34_p0  ;;  %p734_p12 = por %p133_p8, %p40_p3 }
   0xf   : > { %s484_s30 = sshll.u32 %s647_s18, 7  ;;  %s473_s5 = sshll.u32 %s162_s29, 3 }
  0x10   : > { %s877_s27 = scalar_select %p730_p11, 1, 0 }
  0x11   : > { %s878_s28 = scalar_select %p734_p12, 1, 0 }
  0x12   : > { %s743_s8 = scalar_lea.hbm %s869_s0, %s484_s30  ;;  %s166_s9 = scalar_lea.vmem [#allocation2], %s473_s5 }
  0x13   : > { %s174_s10 = sshll.u32 %s166_s9, 4  ;;  %p747_p13 = pnand %p504_p10, %p719_p5  ;;  %s751_s10 = int_to_ptr.vmem [resolvable:$true] %s174_s10 }
  0x14   : > { %s163_s12 = scalar_lea.sflag [#allocation3], %s162_s29  ;;  %s551_s13 = scalar_lea.hbm %s743_s8, 128 }
  0x15   : > { %p552_p2 = scmp.ne.s32.totalorder %s743_s8, %s551_s13  ;;  %p553_p3 = pneg %p747_p13 }
  0x16   : > { %s556_s22 = scalar_lea.hbm %s869_s0, 256  ;;  %p557_p5 = scmp.lt.u32.totalorder %s743_s8, %s869_s0 }
  0x17   : > { %p554_p4 = pnand %p553_p3, %p552_p2  ;;  %p558_p8 = scmp.lt.u32.totalorder %s556_s22, %s551_s13 }
  0x18   : > { %p560_p9 = scmp.lt.u32.totalorder %s551_s13, %s743_s8 }
  0x19   : > { %p555_p7 = pneg %p554_p4  ;;  %p559_p10 = por %p558_p8, %p557_p5 }
  0x1b   : > { %p561_p0 = por %p560_p9, %p559_p10 }
  0x1d   : > { %p562_p1 = pnand %p561_p0, %p555_p7 }
  0x1f   : > { %565 = shalt.err (!%p562_p1)
}
  0x20   : > { %s566_s29 = scalar_lea.vmem %s751_s10, 128  ;;  %s649_s30 = smov [#allocation2]  }
  0x21   : > { %p567_p2 = scmp.ne.s32.totalorder %s751_s10, %s566_s29  ;;  %s571_s5 = sshll.u32 %s649_s30, 4  ;;  %s572_s5 = int_to_ptr.vmem [resolvable:$false] %s571_s5 }
  0x22   : > { %s573_s6 = scalar_lea.vmem %s572_s5, 256  ;;  %p574_p11 = scmp.lt.s32.totalorder %s751_s10, %s572_s5 }
  0x23   : > { %p569_p4 = pnand %p567_p2, %p553_p3  ;;  %p575_p5 = scmp.lt.s32.totalorder %s573_s6, %s566_s29 }
  0x25   : > { %p570_p12 = pneg %p569_p4  ;;  %p576_p8 = por %p575_p5, %p574_p11 }
  0x27   : > { %p577_p9 = pnand %p576_p8, %p570_p12 }
  0x29   : > { %580 = shalt.err (!%p577_p9)
}
  0x2a   : > { %499 = dma.hbm_to_vmem [thread:$0]  (!%p747_p13), %s743_s8, 128, %s751_s10, %s163_s12  }
  0x2b   : > { %p880_p0 = scmp.lt.s32.totalorder %s647_s18, 3  ;;  %p881_p1 = scmp.ge.s32.totalorder %s647_s18, 1 }
  0x2d   : > { %p180_p3 = pnand %p881_p1, %p880_p0 }
  0x2e   : > { %s785_s7 = sand.u32 (!%p180_p3), 1, %s639_s16  }
  0x2f   : > { %183 = sbr.rel (%p180_p3) target bundleno = 420 (0x1a4), region = 36  ;;  %s477_s9 = sshll.u32 (!%p180_p3), %s785_s7, 3 }
  0x30   : > { %s186_s13 = scalar_lea.sflag (!%p180_p3), [#allocation3], %s785_s7  ;;  %s189_s11 = scalar_lea.vmem (!%p180_p3), [#allocation2], %s477_s9 }
  0x36   : > { %626 = dma.done.wait (%p723_p6), %s186_s13, 128  }
  0x37   : > { %628 = vsyncadd (%p723_p6), %s186_s13, 4294967168  ;;  %vm218_vm0 = vcmask 1043456   ;;  %v795_v0 = vld [vmem:[%s189_s11] sm:$0xff]  ;;  %v650_v11 = vmov 0   ;;  %v651_v12 = vmov 2   ;;  %v652_v13 = vmov 1  }
  0x38   : > { %v216_v1 = vcombine.high %v795_v0, %v795_v0  ;;  %v219_v2 = vsel %vm218_vm0, %v795_v0, 0.0  ;;  %v231_v3 = vmul.f32 %v795_v0, %v795_v0  ;;  %v255_v10 = vld [vmem:[%s870_s1] sm:$0xf]  ;;  %542 = vset.pattern.permute.xlu1 %v650_v11  ;;  %544 = vset.pattern.permute.xlu0 %v651_v12  ;;  %v653_v14 = vmov 3   ;;  %s485_s11 = sshll.u32 %s701_s19, 7  ;;  %s213_s26 = scalar_lea.vmem [#allocation5], %s477_s9 }
  0x39   : > { %258 = vperm.xlu1 %542, %v255_v10   ;;  %v359_v29 = vld [vmem:[%s872_s3] sm:$0xf]  ;;  %v261_v35 = vlaneseq  ;;  %s400_s8 = sshll.u32 %s213_s26, 4  ;;  %s825_s14 = scalar_lea.hbm %s873_s4, %s485_s11  ;;  %s827_s8 = int_to_ptr.vmem [resolvable:$true] %s400_s8 }
  0x3a   : > { %v220_v4 = vsel %vm218_vm0, %v216_v1, 0.0  ;;  %v233_v5 = vcombine.high %v231_v3, %v231_v3  ;;  %v235_v6 = vsel %vm218_vm0, %v231_v3, 0.0  ;;  %v372_v32 = vld [vmem:[%s871_s2] sm:$0xf]  ;;  %s386_s20 = scalar_lea.sflag [#allocation4], %s785_s7  ;;  %p882_p11 = scmp.ne.s32.totalorder %s877_s27, 0 }
  0x3b   : > { %v221_v7 = vadd.f32 %v220_v4, %v219_v2  ;;  %v262_v36 = vshrl.u32 %v261_v35, 7  ;;  %s654_s19 = smov [#allocation5]  }
  0x3c   : > { %v236_v8 = vsel %vm218_vm0, %v233_v5, 0.0  ;;  %s585_s9 = sshll.u32 %s654_s19, 4  ;;  %s586_s9 = int_to_ptr.vmem [resolvable:$false] %s585_s9 }
  0x3d   : > { %222 = vadd.xlane.f32.xlu0 %v221_v7  ;;  %v237_v9 = vadd.f32 %v236_v8, %v235_v6  ;;  %543 = vset.pattern.permute.xlu1 %v652_v13  ;;  %v263_v37 = vsub.s32 0, %v262_v36  ;;  %v267_v38 = vsub.s32 4, %v262_v36  ;;  %v287_v39 = vsub.s32 1, %v262_v36  ;;  %p588_p7 = scmp.lt.s32.totalorder %s827_s8, %s586_s9 }
  0x3e   : > { %282 = vperm.xlu1 %543, %v255_v10   ;;  %v291_v40 = vsub.s32 5, %v262_v36  ;;  %v313_v42 = vsub.s32 2, %v262_v36  ;;  %v317_v43 = vsub.s32 6, %v262_v36  ;;  %v339_v50 = vsub.s32 3, %v262_v36 }
  0x3f   : > { %v264_v44 = vrot.slane %v795_v0, %v263_v37  ;;  %v268_v45 = vrot.slane %v795_v0, %v267_v38  ;;  %v288_v46 = vrot.slane %v795_v0, %v287_v39  ;;  %v343_v51 = vsub.s32 7, %v262_v36 }
  0x40   : > { %v292_v47 = vrot.slane %v795_v0, %v291_v40  ;;  %v314_v48 = vrot.slane %v795_v0, %v313_v42  ;;  %v318_v49 = vrot.slane %v795_v0, %v317_v43  ;;  %v340_v59 = vrot.slane %v795_v0, %v339_v50 }
  0x41   : > { %238 = vadd.xlane.f32.xlu0 %v237_v9  ;;  %v274_v52 = vrot.slane %v264_v44, %v263_v37  ;;  %v278_v53 = vrot.slane %v268_v45, %v263_v37  ;;  %v298_v54 = vrot.slane %v288_v46, %v287_v39  ;;  %v344_v60 = vrot.slane %v795_v0, %v343_v51 }
  0x42   : > { %545 = vset.pattern.permute.xlu1 %v653_v14  ;;  %v302_v55 = vrot.slane %v292_v47, %v287_v39  ;;  %v324_v57 = vrot.slane %v314_v48, %v313_v42  ;;  %v328_v58 = vrot.slane %v318_v49, %v313_v42  ;;  %v350_v7 = vrot.slane %v340_v59, %v339_v50 }
  0x43   : > { %334 = vperm.xlu1 %545, %v255_v10   ;;  %v354_v8 = vrot.slane %v344_v60, %v339_v50 }
  0x47   : > { %546 = vset.pattern.permute.xlu1 %v650_v11 }
  0x57   : > { %308 = vperm.xlu0 %544, %v255_v10  }
  0x5b   : > { %547 = vset.pattern.permute.xlu0 %v650_v11 }
  0xb8   : > { %v259_v41 = vpop.permute.xlu1 %258 }
  0xb9   : > { %v279_v61 = vmul.f32 %v274_v52, %v259_v41  ;;  %v280_v62 = vmul.f32 %v278_v53, %v259_v41 }
  0xbd   : > { %v283_v56 = vpop.permute.xlu1 %282 }
  0xbe   : > { %v303_v63 = vmul.f32 %v298_v54, %v283_v56  ;;  %v304_v1 = vmul.f32 %v302_v55, %v283_v56 }
  0xc0   : > { %v305_v5 = vadd.f32 %v303_v63, %v279_v61  ;;  %v306_v6 = vadd.f32 %v304_v1, %v280_v62 }
  0xc2   : > { %v335_v9 = vpop.permute.xlu1 %334 }
  0xc3   : > { %v355_v12 = vmul.f32 %v350_v7, %v335_v9  ;;  %v356_v13 = vmul.f32 %v354_v8, %v335_v9 }
  0xca   : > { %v223_v15 = vpop.xlane.xlu0 %222 }
  0xcb   : > { %v224_v16 = vrot.slane %v223_v15, 4 }
  0xcd   : > { %v225_v17 = vadd.f32 %v224_v16, %v223_v15 }
  0xce   : > { %v239_v18 = vpop.xlane.xlu0 %238 }
  0xcf   : > { %v226_v19 = vrot.slane %v225_v17, 2  ;;  %v240_v20 = vrot.slane %v239_v18, 4 }
  0xd1   : > { %v241_v21 = vadd.f32 %v240_v20, %v239_v18  ;;  %v227_v22 = vadd.f32 %v226_v19, %v225_v17 }
  0xd3   : > { %v242_v23 = vrot.slane %v241_v21, 2  ;;  %v228_v24 = vrot.slane %v227_v22, 1 }
  0xd5   : > { %v229_v25 = vadd.f32 %v228_v24, %v227_v22  ;;  %v243_v26 = vadd.f32 %v242_v23, %v241_v21 }
  0xd6   : > { %v309_v2 = vpop.permute.xlu0 %308 }
  0xd7   : > { %486 = vpush %v229_v25  ;;  %v244_v27 = vrot.slane %v243_v26, 1  ;;  %v329_v3 = vmul.f32 %v324_v57, %v309_v2  ;;  %v330_v4 = vmul.f32 %v328_v58, %v309_v2 }
  0xd9   : > { %v245_v28 = vadd.f32 %v244_v27, %v243_v26  ;;  %v331_v10 = vadd.f32 %v329_v3, %v305_v5  ;;  %v332_v11 = vadd.f32 %v330_v4, %v306_v6 }
  0xdb   : > { %488 = vpush %v245_v28  ;;  %v357_v0 = vadd.f32 %v355_v12, %v331_v10  ;;  %v358_v14 = vadd.f32 %v356_v13, %v332_v11 }
 0x108   : > { %s487_s10 = spop %486 }
 0x109   : > { %s247_s12 = smul.f32 0.0009765625, %s487_s10 }
 0x10b   : > { %v360_v30 = vstv %s247_s12  ;;  %s249_s22 = smul.f32 %s247_s12, %s247_s12 }
 0x10c   : > { %v361_v31 = vmul.f32 %v360_v30, %v359_v29  ;;  %s489_s23 = spop %488 }
 0x10d   : > { %s248_s25 = smul.f32 0.0009765625, %s489_s23  ;;  %s587_s23 = scalar_lea.vmem %s586_s9, 256 }
 0x10e   : > { %364 = vperm.xlu1 %546, %v361_v31  }
 0x10f   : > { %s250_s29 = ssub.f32 %s248_s25, %s249_s22  ;;  %s581_s22 = scalar_lea.vmem %s827_s8, 128 }
 0x110   : > { %p582_p6 = scmp.ne.s32.totalorder %s827_s8, %s581_s22  ;;  %p589_p10 = scmp.lt.s32.totalorder %s587_s23, %s581_s22 }
 0x111   : > { %s251_s6 = sadd.f32 1e-05, %s250_s29 }
 0x112   : > { %375 = vperm.xlu1 %546, %v372_v32   ;;  %p583_p12 = pnand %p582_p6, %p882_p11  ;;  %p590_p2 = por %p589_p10, %p588_p7 }
 0x113   : > { %v252_v33 = vstv %s251_s6 }
 0x114   : > { %549 = vrsqrt.f32 %v252_v33  ;;  %p584_p13 = pneg %p583_p12 }
 0x116   : > { %p591_p4 = pnand %p590_p2, %p584_p13 }
 0x11e   : > { %v550_v34 = vpop.eup %549 }
 0x11f   : > { %490 = vpush %v550_v34 }
 0x150   : > { %s491_s13 = spop %490 }
 0x151   : > { %v369_v18 = vstv %s491_s13 }
 0x18d   : > { %v365_v15 = vpop.permute.xlu1 %364 }
 0x18e   : > { %v367_v16 = vsub.f32 %v357_v0, %v365_v15  ;;  %v368_v17 = vsub.f32 %v358_v14, %v365_v15 }
 0x190   : > { %v370_v19 = vmul.f32 %v369_v18, %v367_v16  ;;  %v371_v20 = vmul.f32 %v369_v18, %v368_v17 }
 0x191   : > { %v376_v21 = vpop.permute.xlu1 %375 }
 0x192   : > { %v378_v22 = vadd.f32 %v376_v21, %v370_v19  ;;  %v379_v23 = vadd.f32 %v376_v21, %v371_v20 }
 0x194   : > { %v382_v24 = vcombine.low %v378_v22, %v379_v23 }
 0x196   : > { %384 = vst [vmem:[%s213_s26] sm:$0xff] %v382_v24 }
 0x197   : > { %594 = shalt.err (!%p591_p4)
}
 0x198   : > { %s595_s7 = scalar_lea.hbm %s825_s14, 128  ;;  %s599_s30 = scalar_lea.hbm %s873_s4, 256 }
 0x199   : > { %p596_p5 = scmp.ne.s32.totalorder %s825_s14, %s595_s7  ;;  %p600_p0 = scmp.lt.u32.totalorder %s825_s14, %s873_s4 }
 0x19a   : > { %p601_p1 = scmp.lt.u32.totalorder %s599_s30, %s595_s7  ;;  %p603_p6 = scmp.lt.u32.totalorder %s595_s7, %s825_s14 }
 0x19b   : > { %p597_p8 = pnand %p596_p5, %p882_p11 }
 0x19c   : > { %p602_p3 = por %p601_p1, %p600_p0 }
 0x19d   : > { %p598_p9 = pneg %p597_p8 }
 0x19e   : > { %p604_p12 = por %p603_p6, %p602_p3 }
 0x1a0   : > { %p605_p13 = pnand %p604_p12, %p598_p9 }
 0x1a2   : > { %608 = shalt.err (!%p605_p13)
}
 0x1a3   : > { %494 = dma.vmem_to_hbm [thread:$0]  (%p882_p11), %s827_s8, 128, %s825_s14, %s386_s20  }
 0x1a4 PF: > { %s412_s13 = sand.u32 1, %s635_s15   ;;  %p883_p7 = scmp.ne.s32.totalorder %s878_s28, 0 }
 0x1a5   : > { %p884_p10 = scmp.ge.s32.totalorder %s647_s18, 2  ;;  %s413_s11 = scalar_lea.sflag [#allocation4], %s412_s13 }
 0x1a7   : > { %p501_p2 = pnand %p884_p10, %p883_p7 }
 0x1a9   : > { %630 = dma.done.wait (!%p501_p2), %s413_s11, 128  }
 0x1aa   : > { %632 = vsyncadd (!%p501_p2), %s413_s11, 4294967168  ;;  %p17_p4 = scmp.ge.s32.totalorder %s705_s21, 4   ;;  %s885_s15 = smov %s639_s16 }
 0x1ab   : > { %s886_s16 = smov %s643_s17  ;;  %s887_s17 = smov %s717_s24 }
 0x1ac   : > { %s888_s18 = smov %s705_s21  ;;  %19 = sbr.rel (!%p17_p4) target bundleno = 5 (0x5), region = 81 }
 0x1b3   :  { %418 = vsyncpa [#allocation3], 1 }
 0x1b4   :  { %420 = vsyncpa [#allocation3 + $0x1], 1 }
 0x1b5   :  { %421 = vsyncpa [#allocation4], 1 }
 0x1b6   :  { %423 = vsyncpa [#allocation4 + $0x1], 1 }

</bundles_post_ra>
